<compile_context>
chip_gen: v5e
topology: v5e:2x2
jax: 0.10.0
libtpu: 0.0.40
codegen_flags: <defaults>
</compile_context>

<pallas_src>
import functools

import numpy as np
import jax
import jax.numpy as jnp
from jax import lax
from jax.experimental import pallas as pl
from jax.experimental.pallas import tpu as pltpu

LANE = 128


def _round_up(n, m):
    return ((n + m - 1) // m) * m


def _pick_tm(B, cap=1024):
    """Batch tile: big enough to amortize ~0.35us/step, multiple of 16 for bf16
    sublane packing, and split into 2 balanced steps when that covers the batch
    (megacore load balance on v7x)."""
    Bp = _round_up(B, 16)
    if Bp <= 32:
        return Bp                               # tiny batch: single step
    if Bp <= 2 * cap:
        return _round_up(pl.cdiv(Bp, 2), 16)    # exactly 2 balanced steps
    return cap                                  # large batch: cap-sized tiles


def _net_kernel(x_ref, w1_ref, b1_ref, w2_ref, b2_ref, scales_ref, out_ref, *,
                a_dim, eup_bf16):
    """Fused forward: 2 bf16 MXU matmuls (f32 acc) + one lane-dense f32 store."""
    x = x_ref[...]                                            # bf16 (tm, s_dim)

    # layer 1: h = relu(x @ [Wa1 | Wc1 | 0] + [ba1 | bc1 | 0])
    h = jnp.dot(x, w1_ref[...], preferred_element_type=jnp.float32)
    h = jnp.maximum(h + b1_ref[...], 0.0)                     # f32 (tm, 128)

    # layer 2: head = [a1 | c1 | 0] @ blockdiag([Wmu|Wsig], Wv) + [bmu|bsig|bv|0]
    head = jnp.dot(h.astype(jnp.bfloat16), w2_ref[...],
                   preferred_element_type=jnp.float32) + b2_ref[...]

    # Transcendentals on the EUP; bf16 on v6e/v7x (packed vregs), f32 on v5e.
    t = head.astype(jnp.bfloat16) if eup_bf16 else head
    mu_full = jnp.tanh(t).astype(jnp.float32) * scales_ref[...]
    sig_full = jax.nn.softplus(t).astype(jnp.float32) + 0.0001

    # Per-lane select, then ONE dense unmasked (tm, 128) store:
    #   lanes [0, a_dim)       -> mu     = tanh(head) * scales
    #   lanes [a_dim, 2*a_dim) -> sigma  = softplus(head) + 1e-4
    #   lane  2*a_dim          -> values = head (identity)
    #   padded lanes           -> head (== 0 by construction), sliced off later
    lane = lax.broadcasted_iota(jnp.int32, head.shape, 1)
    out = jnp.where(lane < a_dim, mu_full,
                    jnp.where(lane < 2 * a_dim, sig_full, head))
    out_ref[...] = out


def net_forward(x, params, *, batch_cap=1024):
    """Fused forward pass. Always uses the tiled, pipelined grid path."""
    B, s_dim = x.shape
    a_dim = int(params["a_dim"])
    w1, b1 = params["w1"], params["b1"]
    w2, b2 = params["w2"], params["b2"]
    scales = params["scales_full"]
    OP = w2.shape[1]

    tm = _pick_tm(B, batch_cap)
    B_pad = _round_up(B, tm)
    xb = x.astype(jnp.bfloat16)
    if B_pad != B:
        xb = jnp.pad(xb, ((0, B_pad - B), (0, 0)))

    # bf16 EUP only on v6e / v7x; v5e keeps the transcendental path in f32.
    kind = jax.devices()[0].device_kind.lower()
    eup_bf16 = ("v6" in kind) or ("v7" in kind)

    kernel = functools.partial(_net_kernel, a_dim=a_dim, eup_bf16=eup_bf16)

    def whole(shape):
        # weights/biases: same (only) block every step -> resident in VMEM
        return pl.BlockSpec(shape, lambda i: (0, 0))

    out = pl.pallas_call(
        kernel,
        out_shape=jax.ShapeDtypeStruct((B_pad, OP), jnp.float32),
        grid_spec=pltpu.PrefetchScalarGridSpec(
            num_scalar_prefetch=0,
            grid=(B_pad // tm,),
            in_specs=[
                pl.BlockSpec((tm, s_dim), lambda i: (i, 0)),
                whole(w1.shape), whole(b1.shape),
                whole(w2.shape), whole(b2.shape),
                whole(scales.shape),
            ],
            out_specs=pl.BlockSpec((tm, OP), lambda i: (i, 0)),
        ),
        compiler_params=pltpu.CompilerParams(
            dimension_semantics=("parallel",)),   # megacore sharding on v7x
    )(xb, w1, b1, w2, b2, scales)

    # Slicing stays inside the same jit as the pallas_call so XLA fuses it.
    mu = out[:B, :a_dim]
    sigma = out[:B, a_dim:2 * a_dim]
    values = out[:B, 2 * a_dim:2 * a_dim + 1]
    return mu, sigma, values


def init_params(key, s_dim, a_dim, h_dim, action_ranges):
    """Synthetic init (mirrors set_init: small-std normal W, zero b) plus the
    fused, lane-padded, bf16 weight layout consumed by the kernel."""
    assert len(action_ranges) == a_dim
    ks = jax.random.split(key, 5)

    def linear(k, fan_in, fan_out):
        w = jax.random.normal(k, (fan_in, fan_out), jnp.float32) * 0.1
        b = jnp.zeros((fan_out,), jnp.float32)
        return w, b

    wa1, ba1 = linear(ks[0], s_dim, h_dim)
    wmu, bmu = linear(ks[1], h_dim, a_dim)
    wsig, bsig = linear(ks[2], h_dim, a_dim)
    wc1, bc1 = linear(ks[3], s_dim, h_dim)
    wv, bv = linear(ks[4], h_dim, 1)

    mu_scales = np.ones(a_dim, dtype=np.float32)
    for i, r in enumerate(action_ranges):
        mu_scales[i] = (r[1] - r[0]) / 2.0
    mu_scales = jnp.asarray(mu_scales, jnp.float32)

    # ---- host-side fusion + lane padding (done once) ----
    HP = _round_up(2 * h_dim, LANE)           # fused hidden width, lane-padded
    OP = _round_up(2 * a_dim + 1, LANE)       # fused output width, lane-padded

    w1 = np.zeros((s_dim, HP), np.float32)
    w1[:, :h_dim] = np.asarray(wa1)
    w1[:, h_dim:2 * h_dim] = np.asarray(wc1)
    b1 = np.zeros((1, HP), np.float32)
    b1[0, :h_dim] = np.asarray(ba1)
    b1[0, h_dim:2 * h_dim] = np.asarray(bc1)

    w2 = np.zeros((HP, OP), np.float32)
    w2[:h_dim, :a_dim] = np.asarray(wmu)                           # a1 -> mu
    w2[:h_dim, a_dim:2 * a_dim] = np.asarray(wsig)                 # a1 -> sigma
    w2[h_dim:2 * h_dim, 2 * a_dim:2 * a_dim + 1] = np.asarray(wv)  # c1 -> v
    b2 = np.zeros((1, OP), np.float32)
    b2[0, :a_dim] = np.asarray(bmu)
    b2[0, a_dim:2 * a_dim] = np.asarray(bsig)
    b2[0, 2 * a_dim] = float(np.asarray(bv)[0])

    scales_full = np.ones((1, OP), np.float32)
    scales_full[0, :a_dim] = np.asarray(mu_scales)

    # Correctness of the padded output lanes depends on exact zero padding.
    assert np.all(w1[:, 2 * h_dim:] == 0.0) and np.all(b1[0, 2 * h_dim:] == 0.0)
    assert np.all(w2[:, 2 * a_dim + 1:] == 0.0) and np.all(b2[0, 2 * a_dim + 1:] == 0.0)
    assert np.all(w2[2 * h_dim:, :] == 0.0)

    return dict(
        # raw f32 weights (for the pure-JAX reference)
        wa1=wa1, ba1=ba1, wmu=wmu, bmu=bmu, wsig=wsig, bsig=bsig,
        wc1=wc1, bc1=bc1, wv=wv, bv=bv, mu_scales=mu_scales,
        # fused, lane-padded kernel weights: bf16 matmul operands, f32 bias/scale
        w1=jnp.asarray(w1).astype(jnp.bfloat16),
        b1=jnp.asarray(b1),
        w2=jnp.asarray(w2).astype(jnp.bfloat16),
        b2=jnp.asarray(b2),
        scales_full=jnp.asarray(scales_full),
        a_dim=a_dim,
    )


def net_forward_ref(x, p):
    """Pure-JAX f32 reference for correctness check (un-fused weights)."""
    a1 = jax.nn.relu(x @ p["wa1"] + p["ba1"])
    mu = jnp.tanh(a1 @ p["wmu"] + p["bmu"]) * p["mu_scales"]
    sigma = jax.nn.softplus(a1 @ p["wsig"] + p["bsig"]) + 0.0001
    c1 = jax.nn.relu(x @ p["wc1"] + p["bc1"])
    values = c1 @ p["wv"] + p["bv"]
    return mu, sigma, values


# TODO(synk): choose_action / loss_func (Normal sampling, log_prob, entropy,
# losses) are host/training-side and not part of this forward kernel; fusing
# them into the kernel would eliminate the padded-output writeback entirely.


if __name__ == "__main__":
    s_dim, a_dim, h_dim = 16, 4, 32
    action_ranges = [(-2.0, 2.0), (-1.0, 1.0), (0.0, 4.0), (-3.0, 3.0)]

    key = jax.random.PRNGKey(0)
    k_x, k_p, k_xb = jax.random.split(key, 3)
    params = init_params(k_p, s_dim, a_dim, h_dim, action_ranges)

    fwd = jax.jit(functools.partial(net_forward, params=params))

    def check(a, b):
        return np.allclose(np.asarray(a), np.asarray(b), rtol=2e-2, atol=2e-2)

    # --- small batch: single grid step ---
    B = 8
    x = jax.random.normal(k_x, (B, s_dim), jnp.float32)
    mu, sigma, values = fwd(x)
    jax.block_until_ready((mu, sigma, values))

    mu_r, sigma_r, values_r = net_forward_ref(x, params)
    assert mu.shape == (B, a_dim) and sigma.shape == (B, a_dim) and values.shape == (B, 1)
    assert check(mu, mu_r) and check(sigma, sigma_r) and check(values, values_r)
    assert np.all(np.asarray(sigma) > 0.0)

    # --- ragged larger batch: 2 balanced grid steps with padded last rows ---
    Bb = 300
    xb = jax.random.normal(k_xb, (Bb, s_dim), jnp.float32)
    mu_b, sigma_b, values_b = fwd(xb)
    jax.block_until_ready((mu_b, sigma_b, values_b))

    mu_br, sigma_br, values_br = net_forward_ref(xb, params)
    assert mu_b.shape == (Bb, a_dim) and values_b.shape == (Bb, 1)
    assert check(mu_b, mu_br) and check(sigma_b, sigma_br) and check(values_b, values_br)
    assert np.all(np.asarray(sigma_b) > 0.0)

    print("KERNEL_OK")
</pallas_src>

<mosaic_0001>
module attributes {stable_mosaic.version = 11 : i64} {
  func.func @_net_kernel(%arg0: i32, %arg1: memref<16x16xbf16, #tpu.memory_space<vmem>>, %arg2: memref<16x128xbf16, #tpu.memory_space<vmem>>, %arg3: memref<1x128xf32, #tpu.memory_space<vmem>>, %arg4: memref<128x128xbf16, #tpu.memory_space<vmem>>, %arg5: memref<1x128xf32, #tpu.memory_space<vmem>>, %arg6: memref<1x128xf32, #tpu.memory_space<vmem>>, %arg7: memref<16x128xf32, #tpu.memory_space<vmem>>) attributes {dimension_semantics = [#tpu.dimension_semantics<parallel>], iteration_bounds = array<i64: 1>, scalar_prefetch = 0 : i64, scratch_operands = 0 : i64, tpu.core_type = #tpu.core_type<tc>, window_params = [{transform_indices = @transform_0, window_bounds = array<i64: 16, 16>}, {pipeline_mode = #tpu.pipeline_mode<synchronous>, transform_indices = @transform_1, window_bounds = array<i64: 16, 128>}, {pipeline_mode = #tpu.pipeline_mode<synchronous>, transform_indices = @transform_2, window_bounds = array<i64: 1, 128>}, {pipeline_mode = #tpu.pipeline_mode<synchronous>, transform_indices = @transform_3, window_bounds = array<i64: 128, 128>}, {pipeline_mode = #tpu.pipeline_mode<synchronous>, transform_indices = @transform_4, window_bounds = array<i64: 1, 128>}, {pipeline_mode = #tpu.pipeline_mode<synchronous>, transform_indices = @transform_5, window_bounds = array<i64: 1, 128>}, {transform_indices = @transform_6, window_bounds = array<i64: 16, 128>}]} {
    %c0 = arith.constant 0 : index
    %c0_0 = arith.constant 0 : index
    %0 = vector.load %arg1[%c0, %c0_0] : memref<16x16xbf16, #tpu.memory_space<vmem>>, vector<16x16xbf16>
    %c0_1 = arith.constant 0 : index
    %c0_2 = arith.constant 0 : index
    %1 = vector.load %arg2[%c0_1, %c0_2] : memref<16x128xbf16, #tpu.memory_space<vmem>>, vector<16x128xbf16>
    %cst = arith.constant dense<0.000000e+00> : vector<16x128xf32>
    %2 = tpu.matmul %0, %1, %cst {dimension_numbers = #tpu.dot_dimension_numbers<[1], [0], [0], [1], [0, 0, 1, 1], [], []>} : vector<16x16xbf16>, vector<16x128xbf16>, vector<16x128xf32> -> vector<16x128xf32>
    %c0_3 = arith.constant 0 : index
    %c0_4 = arith.constant 0 : index
    %3 = vector.load %arg3[%c0_3, %c0_4] : memref<1x128xf32, #tpu.memory_space<vmem>>, vector<1x128xf32>
    %4 = vector.broadcast %3 : vector<1x128xf32> to vector<16x128xf32>
    %5 = arith.addf %2, %4 : vector<16x128xf32>
    %cst_5 = arith.constant 0.000000e+00 : f32
    %6 = vector.broadcast %cst_5 : f32 to vector<16x128xf32>
    %7 = arith.maximumf %5, %6 : vector<16x128xf32>
    %8 = arith.truncf %7 : vector<16x128xf32> to vector<16x128xbf16>
    %c0_6 = arith.constant 0 : index
    %c0_7 = arith.constant 0 : index
    %9 = vector.load %arg4[%c0_6, %c0_7] : memref<128x128xbf16, #tpu.memory_space<vmem>>, vector<128x128xbf16>
    %cst_8 = arith.constant dense<0.000000e+00> : vector<16x128xf32>
    %10 = tpu.matmul %8, %9, %cst_8 {dimension_numbers = #tpu.dot_dimension_numbers<[1], [0], [0], [1], [0, 0, 1, 1], [], []>} : vector<16x128xbf16>, vector<128x128xbf16>, vector<16x128xf32> -> vector<16x128xf32>
    %c0_9 = arith.constant 0 : index
    %c0_10 = arith.constant 0 : index
    %11 = vector.load %arg5[%c0_9, %c0_10] : memref<1x128xf32, #tpu.memory_space<vmem>>, vector<1x128xf32>
    %12 = vector.broadcast %11 : vector<1x128xf32> to vector<16x128xf32>
    %13 = arith.addf %10, %12 : vector<16x128xf32>
    %14 = math.tanh %13 : vector<16x128xf32>
    %c0_11 = arith.constant 0 : index
    %c0_12 = arith.constant 0 : index
    %15 = vector.load %arg6[%c0_11, %c0_12] : memref<1x128xf32, #tpu.memory_space<vmem>>, vector<1x128xf32>
    %16 = vector.broadcast %15 : vector<1x128xf32> to vector<16x128xf32>
    %17 = arith.mulf %14, %16 : vector<16x128xf32>
    %cst_13 = arith.constant 0.000000e+00 : f32
    %18 = vector.broadcast %cst_13 : f32 to vector<16x128xf32>
    %19 = arith.maximumf %13, %18 : vector<16x128xf32>
    %20 = vector.broadcast %cst_13 : f32 to vector<16x128xf32>
    %21 = arith.subf %13, %20 : vector<16x128xf32>
    %22 = arith.cmpf one, %21, %21 : vector<16x128xf32>
    %23 = vector.broadcast %cst_13 : f32 to vector<16x128xf32>
    %24 = arith.addf %13, %23 : vector<16x128xf32>
    %25 = math.absf %21 : vector<16x128xf32>
    %cst_14 = arith.constant 0.000000e+00 : f32
    %26 = vector.broadcast %cst_14 : f32 to vector<16x128xf32>
    %27 = arith.subf %26, %25 : vector<16x128xf32>
    %28 = math.exp %27 : vector<16x128xf32>
    %29 = math.log1p %28 : vector<16x128xf32>
    %30 = arith.addf %19, %29 : vector<16x128xf32>
    %31 = arith.select %22, %24, %30 : vector<16x128xi1>, vector<16x128xf32>
    %cst_15 = arith.constant 9.99999974E-5 : f32
    %32 = vector.broadcast %cst_15 : f32 to vector<16x128xf32>
    %33 = arith.addf %31, %32 : vector<16x128xf32>
    %34 = tpu.iota {dimensions = array<i32: 1>} : vector<16x128xi32>
    %c4_i32 = arith.constant 4 : i32
    %35 = vector.broadcast %c4_i32 : i32 to vector<16x128xi32>
    %36 = arith.cmpi slt, %34, %35 : vector<16x128xi32>
    %c8_i32 = arith.constant 8 : i32
    %37 = vector.broadcast %c8_i32 : i32 to vector<16x128xi32>
    %38 = arith.cmpi slt, %34, %37 : vector<16x128xi32>
    %39 = arith.select %38, %33, %13 : vector<16x128xi1>, vector<16x128xf32>
    %40 = arith.select %36, %17, %39 : vector<16x128xi1>, vector<16x128xf32>
    %c0_16 = arith.constant 0 : index
    %c0_17 = arith.constant 0 : index
    %41 = vector.load %arg7[%c0_16, %c0_17] : memref<16x128xf32, #tpu.memory_space<vmem>>, vector<16x128xf32>
    tpu.vector_store %arg7[%c0_16, %c0_17], %40 {strides = array<i32>} : memref<16x128xf32, #tpu.memory_space<vmem>>, vector<16x128xf32>,
    return
  }
  func.func @transform_0(%arg0: i32) -> (i32, i32) {
    %c0_i32 = arith.constant 0 : i32
    %c0_i32_0 = arith.constant 0 : i32
    return %arg0, %c0_i32 : i32, i32
  }
  func.func @transform_1(%arg0: i32) -> (i32, i32) {
    %c0_i32 = arith.constant 0 : i32
    %c0_i32_0 = arith.constant 0 : i32
    %c0_i32_1 = arith.constant 0 : i32
    return %c0_i32, %c0_i32_0 : i32, i32
  }
  func.func @transform_2(%arg0: i32) -> (i32, i32) {
    %c0_i32 = arith.constant 0 : i32
    %c0_i32_0 = arith.constant 0 : i32
    %c0_i32_1 = arith.constant 0 : i32
    return %c0_i32, %c0_i32_0 : i32, i32
  }
  func.func @transform_3(%arg0: i32) -> (i32, i32) {
    %c0_i32 = arith.constant 0 : i32
    %c0_i32_0 = arith.constant 0 : i32
    %c0_i32_1 = arith.constant 0 : i32
    return %c0_i32, %c0_i32_0 : i32, i32
  }
  func.func @transform_4(%arg0: i32) -> (i32, i32) {
    %c0_i32 = arith.constant 0 : i32
    %c0_i32_0 = arith.constant 0 : i32
    %c0_i32_1 = arith.constant 0 : i32
    return %c0_i32, %c0_i32_0 : i32, i32
  }
  func.func @transform_5(%arg0: i32) -> (i32, i32) {
    %c0_i32 = arith.constant 0 : i32
    %c0_i32_0 = arith.constant 0 : i32
    %c0_i32_1 = arith.constant 0 : i32
    return %c0_i32, %c0_i32_0 : i32, i32
  }
  func.func @transform_6(%arg0: i32) -> (i32, i32) {
    %c0_i32 = arith.constant 0 : i32
    %c0_i32_0 = arith.constant 0 : i32
    return %arg0, %c0_i32 : i32, i32
  }
}

</mosaic_0001>

<bundles_post_ra>
// kernel: net_forward.1
= control target key start
LH: loop header
LB: loop body
LE: loop exit
PB: predicated region body
PF: predicated region fallthrough
CT: control target
= control target key end

     0   :  { %11 = vsyncpa [#allocation3], 0  ;;  %s318_s24 = smov [#allocation2]   ;;  %s319_s26 = smov 64   ;;  %s384_s0 = inlined_call_operand.vmem [shape: bf16[16,16], index: 0, kind: input, shape index: {}]   ;;  %s385_s1 = inlined_call_operand.vmem [shape: bf16[16,128], index: 1, kind: input, shape index: {}]   ;;  %s386_s2 = inlined_call_operand.vmem [shape: f32[1,128], index: 2, kind: input, shape index: {}, may-alias: {2,4}]   ;;  %s387_s3 = inlined_call_operand.hbm [shape: bf16[128,128], index: 3, kind: input, shape index: {}]   ;;  %s388_s4 = inlined_call_operand.vmem [shape: f32[1,128], index: 4, kind: input, shape index: {}, may-alias: {2,4}]   ;;  %s389_s5 = inlined_call_operand.vmem [shape: f32[1,128], index: 5, kind: input, shape index: {}]   ;;  %s390_s6 = inlined_call_operand.vmem [shape: f32[16,128], index: 6, kind: output, shape index: {}]  }
   0x1   :  { %s22_s23 = sshll.u32 %s387_s3, 4  ;;  %s24_s25 = sshll.u32 %s318_s24, 4  ;;  %s23_s23 = int_to_ptr.hbm [resolvable:$true] %s22_s23  ;;  %s25_s25 = int_to_ptr.vmem [resolvable:$true] %s24_s25 }
   0x2   :  { %s320_s27 = smov 4  }
   0x3   :  { %30 = dma.hbm_to_vmem [thread:$0]  %s23_s23, 1024, %s25_s25, [#allocation3], %s319_s26, %s319_s26, %s320_s27  }
   0x4   :  { %316 = dma.done.wait [#allocation3], 1024  }
   0x5   :  { %317 = vsyncadd [#allocation3], 4294966272  ;;  %v265_v0 = vld [vmem:[%s385_s1] sm:$0xff]  ;;  %v273_v1 = vld [vmem:[#allocation2 + $0x38] sm:$0xff]  ;;  %vm59_vm0 = vcmask 130048   ;;  %v208_v34 = vlaneseq }
   0x6   :  { %v264_v2 = vld [vmem:[%s384_s0] sm:$0xff]  ;;  %70 = vmatpush.bf16.msra.mxu0 %v265_v0  ;;  %148 = vmatpush.bf16.msra.mxu1 %v273_v1  ;;  %v272_v3 = vld [vmem:[#allocation2 + $0x30] sm:$0xff]  ;;  %v271_v4 = vld [vmem:[#allocation2 + $0x28] sm:$0xff] }
   0x7   :  { %v270_v5 = vld [vmem:[#allocation2 + $0x20] sm:$0xff]  ;;  %v269_v6 = vld [vmem:[#allocation2 + $0x18] sm:$0xff]  ;;  %v268_v7 = vld [vmem:[#allocation2 + $0x10] sm:$0xff]  ;;  %v209_v42 = vand.u32 127, %v208_v34 }
   0x8   :  { %v267_v8 = vld [vmem:[#allocation2 + $0x8] sm:$0xff]  ;;  %v266_v9 = vld [vmem:[#allocation2] sm:$0xff] }
   0x9   :  { %231 = vmatmul.msk.bf16.vlgmr.msra.gmra.mxu0 %vm59_vm0, %v264_v2  ;;  %v277_v11 = vld [vmem:[%s386_s2] ss:$0 sm:$0xff]  ;;  %vm211_vm3 = vcmp.lt.s32.totalorder %v209_v42, 8  ;;  %vm210_vm4 = vcmp.lt.s32.totalorder %v209_v42, 4 }
   0xa   :  { %149 = vmatpush.bf16.msra.mxu1 %v272_v3  ;;  %v278_v18 = vld [vmem:[%s388_s4] ss:$0 sm:$0xff] }
   0xb   :  { %v279_v44 = vld [vmem:[%s389_s5] ss:$0 sm:$0xff] }
   0xe   :  { %150 = vmatpush.bf16.msra.mxu1 %v271_v4 }
  0x12   :  { %151 = vmatpush.bf16.msra.mxu1 %v270_v5 }
  0x16   :  { %152 = vmatpush.bf16.msra.mxu1 %v269_v6 }
  0x1a   :  { %153 = vmatpush.bf16.msra.mxu1 %v268_v7 }
  0x1e   :  { %154 = vmatpush.bf16.msra.mxu1 %v267_v8 }
  0x22   :  { %155 = vmatpush.bf16.msra.mxu1 %v266_v9 }
  0x86   :  { %v72_v10 = vpop.f32.mrf.mxu0 }
  0x87   :  { %v73_v12 = vadd.f32 %v277_v11, %v72_v10 }
  0x89   :  { %v77_v15 = vmax.f32 %v73_v12, 0.0 }
  0x8e   :  { %v74_v13 = vpop.f32.mrf.mxu0 }
  0x8f   :  { %v75_v14 = vadd.f32 %v277_v11, %v74_v13 }
  0x91   :  { %v78_v16 = vmax.f32 %v75_v14, 0.0 }
  0x93   :  { %v79_v17 = vpack.c.bf16 %v78_v16, %v77_v15 }
  0x95   :  { %156 = vmatmul.bf16.vlgmr.msra.gmra.mxu1 %v79_v17 }
 0x112   :  { %v157_v19 = vpop.f32.mrf.mxu1 }
 0x113   :  { %v158_v20 = vadd.f32 %v278_v18, %v157_v19 }
 0x115   :  { %v176_v21 = vand.u32 2147483647, %v158_v20  ;;  %v170_v41 = vmax.f32 %v158_v20, 0.0  ;;  %vm172_vm2 = vcmp.ne.f32.partialorder %v158_v20, %v158_v20 }
 0x117   :  { %v178_v22 = vsub.f32 0.0, %v176_v21 }
 0x119   :  { %v180_v23 = vmul.f32 1.442695, %v178_v22 }
 0x11a   :  { %v159_v24 = vpop.f32.mrf.mxu1 }
 0x11b   :  { %280 = vpow2.f32 %v180_v23  ;;  %v160_v25 = vadd.f32 %v278_v18, %v159_v24 }
 0x11d   :  { %v177_v26 = vand.u32 2147483647, %v160_v25  ;;  %v171_v57 = vmax.f32 %v160_v25, 0.0  ;;  %vm173_vm6 = vcmp.ne.f32.partialorder %v160_v25, %v160_v25 }
 0x11f   :  { %v179_v27 = vsub.f32 0.0, %v177_v26 }
 0x121   :  { %v281_v28 = vpop.eup %280  ;;  %v182_v29 = vmul.f32 1.442695, %v179_v27 }
 0x122   :  { %v184_v30 = vadd.f32 1.0, %v281_v28  ;;  %v187_v31 = vmul.f32 -0.5, %v281_v28  ;;  %v190_v33 = vand.u32 2147483647, %v281_v28 }
 0x123   :  { %282 = vpow2.f32 %v182_v29 }
 0x124   :  { %284 = vlog2.f32 %v184_v30  ;;  %v188_v32 = vadd.f32 1.0, %v187_v31  ;;  %vm191_vm1 = vcmp.lt.f32.partialorder %v190_v33, 0.0004427343 }
 0x125   :  { %286 = vtanh.f32 %v158_v20 }
 0x126   :  { %v189_v39 = vmul.f32 %v281_v28, %v188_v32 }
 0x129   :  { %v283_v35 = vpop.eup %282 }
 0x12a   :  { %v285_v36 = vpop.eup %284  ;;  %v193_v37 = vadd.f32 1.0, %v283_v35  ;;  %v196_v40 = vmul.f32 -0.5, %v283_v35  ;;  %v199_v49 = vand.u32 2147483647, %v283_v35 }
 0x12b   :  { %v186_v38 = vmul.f32 0.6931472, %v285_v36  ;;  %v287_v46 = vpop.eup %286 }
 0x12c   :  { %288 = vlog2.f32 %v193_v37  ;;  %v197_v47 = vadd.f32 1.0, %v196_v40  ;;  %v168_v52 = vmul.f32 %v287_v46, %v279_v44  ;;  %vm200_vm5 = vcmp.lt.f32.partialorder %v199_v49, 0.0004427343 }
 0x12d   :  { %v192_v43 = vsel %vm191_vm1, %v189_v39, %v186_v38  ;;  %290 = vtanh.f32 %v160_v25 }
 0x12e   :  { %v202_v45 = vadd.f32 %v192_v43, %v170_v41  ;;  %v198_v55 = vmul.f32 %v283_v35, %v197_v47 }
 0x130   :  { %v204_v48 = vsel %vm172_vm2, %v158_v20, %v202_v45 }
 0x131   :  { %v206_v50 = vadd.f32 0.0001, %v204_v48 }
 0x132   :  { %v289_v51 = vpop.eup %288 }
 0x133   :  { %v212_v53 = vsel %vm211_vm3, %v206_v50, %v158_v20  ;;  %v195_v54 = vmul.f32 0.6931472, %v289_v51  ;;  %v291_v60 = vpop.eup %290 }
 0x134   :  { %v214_v56 = vsel %vm210_vm4, %v168_v52, %v212_v53  ;;  %v169_v63 = vmul.f32 %v291_v60, %v279_v44 }
 0x135   :  { %216 = vst [vmem:[%s390_s6] sm:$0xff] %v214_v56  ;;  %v201_v58 = vsel %vm200_vm5, %v198_v55, %v195_v54 }
 0x136   :  { %v203_v59 = vadd.f32 %v201_v58, %v171_v57 }
 0x138   :  { %v205_v61 = vsel %vm173_vm6, %v160_v25, %v203_v59 }
 0x139   :  { %v207_v62 = vadd.f32 0.0001, %v205_v61 }
 0x13b   :  { %v213_v0 = vsel %vm211_vm3, %v207_v62, %v160_v25 }
 0x13c   :  { %v215_v1 = vsel %vm210_vm4, %v169_v63, %v213_v0 }
 0x13d   :  { %217 = vst [vmem:[%s390_s6 + $0x8] sm:$0xff] %v215_v1 }
 0x13e   :  { %222 = vsyncpa [#allocation3], 1 }

</bundles_post_ra>
